<compile_context>
chip_gen: v7x
topology: tpu7x:2x2x1
jax: 0.10.0
libtpu: 0.0.40
codegen_flags: <defaults>
</compile_context>

<pallas_src>
import math
import functools

import jax
import jax.numpy as jnp
from jax import lax
from jax.experimental import pallas as pl
from jax.experimental.pallas import tpu as pltpu


# ----------------------------- in-kernel helpers ------------------------------

_SQRT_HALF = 0.7071067811865476


def _erf_approx(z):
    # Abramowitz & Stegun 7.1.26, |error| < 1.5e-7 (exact-GELU semantics at f32).
    a1, a2, a3, a4, a5 = (0.254829592, -0.284496736, 1.421413741,
                          -1.453152027, 1.061405429)
    p = 0.3275911
    za = jnp.abs(z)
    t = 1.0 / (1.0 + p * za)
    poly = ((((a5 * t + a4) * t + a3) * t + a2) * t + a1) * t
    e = 1.0 - poly * jnp.exp(-za * za)
    return jnp.where(z >= 0.0, e, -e)


def _gelu_exact(h):
    return 0.5 * h * (1.0 + _erf_approx(h * _SQRT_HALF))


# ------------------------------- Pallas kernels --------------------------------

def _moe_gate_kernel(x_ref, wg_ref, gw_ref, *, temperature):
    """Dense top-2 combine weights for one token tile (all in f32).

    x_ref: (tm, C)   wg_ref: (E, C)   gw_ref: (tm, E) (exactly 0 for non-selected experts)

    Softmax normalization is intentionally skipped: top-2 selection on
    p = exp(shifted logits) is identical, and the row-sum factor cancels exactly in the
    pair renormalization m_k / (m1 + m2).
    """
    x = x_ref[...]
    # logits = x @ wg.T  (contract feature axes directly; no transposed weight copy)
    logits = lax.dot_general(x, wg_ref[...], (((1,), (1,)), ((), ())),
                             preferred_element_type=jnp.float32)
    logits = logits * (1.0 / temperature)
    p = jnp.exp(logits - jnp.max(logits, axis=-1, keepdims=True))   # max entry == 1.0

    E = p.shape[-1]
    colf = lax.broadcasted_iota(jnp.int32, p.shape, 1).astype(jnp.float32)
    # top-1 (first-occurrence tie-break, matching lax.top_k), then top-2 on the remainder
    m1 = jnp.max(p, axis=-1, keepdims=True)
    i1 = jnp.min(jnp.where(p == m1, colf, float(E)), axis=-1, keepdims=True)
    mask1 = colf == i1
    p_rest = jnp.where(mask1, -1.0, p)                      # p >= 0, so -1 marks "removed"
    m2 = jnp.max(p_rest, axis=-1, keepdims=True)
    i2 = jnp.min(jnp.where(p_rest == m2, colf, float(E)), axis=-1, keepdims=True)
    mask2 = colf == i2
    w = jnp.where(mask1, m1, 0.0) + jnp.where(mask2, m2, 0.0)
    # Exact divide (once per token over E lanes): keeps combine weights bit-faithful.
    gw_ref[...] = w / (m1 + m2)


def _moe_expert_resident_kernel(flags_ref, x_ref, w1_ref, w2t_ref, gw_ref, o_ref, *,
                                n_hk):
    """One (token-tile i, expert e) step; expert weights fully resident in VMEM.

    flags_ref: SMEM (n_tiles*E,) int32 -- 1 iff any token of tile i routed to expert e.
    x_ref: (tm, C) [compute dtype]   w1_ref/w2t_ref: (E, n_hk, th, C) [compute dtype]
    gw_ref: (tm, E) f32              o_ref: (tm, C) f32 accumulator (resident over e).
    """
    i = pl.program_id(0)
    e = pl.program_id(1)
    n_experts = gw_ref.shape[-1]

    @pl.when(e == 0)
    def _init():
        o_ref[...] = jnp.zeros_like(o_ref)

    @pl.when(flags_ref[i * n_experts + e] != 0)      # skip blocks with no routed token
    def _compute():
        x = x_ref[...].astype(w1_ref.dtype)
        # per-token combine weight of expert e -- extracted ONCE per (tile, expert)
        lane = lax.broadcasted_iota(jnp.int32, gw_ref.shape, 1)
        w_e = jnp.sum(jnp.where(lane == e, gw_ref[...], 0.0), axis=-1, keepdims=True)

        def body(hk, acc):
            # h = GELU(x @ W1_e[chunk].T): C-contraction completes in-step (GELU exact).
            h = lax.dot_general(x, w1_ref[e, hk], (((1,), (1,)), ((), ())),
                                preferred_element_type=jnp.float32)
            h = _gelu_exact(h)                                   # f32 elementwise
            y = jnp.dot(h.astype(w2t_ref.dtype), w2t_ref[e, hk],
                        preferred_element_type=jnp.float32)
            return acc + y

        acc = lax.fori_loop(0, n_hk, body, jnp.zeros(o_ref.shape, jnp.float32),
                            unroll=n_hk <= 8)
        o_ref[...] += w_e * acc                                  # one combine per (i, e)


def _moe_expert_streaming_kernel(flags_ref, x_ref, w1_ref, w2t_ref, gw_ref, o_ref,
                                 we_ref):
    """Fallback: stream (1,1,th,C) weight chunks per grid step (weights too big for VMEM).

    flags_ref: SMEM (n_tiles*E,) int32.  we_ref: (tm,1) f32 VMEM scratch caching the
    per-expert combine weight across the hk axis.
    """
    i = pl.program_id(0)
    e = pl.program_id(1)
    hk = pl.program_id(2)
    n_experts = gw_ref.shape[-1]

    @pl.when((e == 0) & (hk == 0))
    def _init():
        o_ref[...] = jnp.zeros_like(o_ref)

    @pl.when(flags_ref[i * n_experts + e] != 0)
    def _compute():
        @pl.when(hk == 0)                     # hoist gate-weight extraction out of hk loop
        def _gate_weight():
            lane = lax.broadcasted_iota(jnp.int32, gw_ref.shape, 1)
            we_ref[...] = jnp.sum(jnp.where(lane == e, gw_ref[...], 0.0),
                                  axis=-1, keepdims=True)

        x = x_ref[...].astype(w1_ref.dtype)
        h = lax.dot_general(x, w1_ref[0, 0], (((1,), (1,)), ((), ())),
                            preferred_element_type=jnp.float32)
        h = _gelu_exact(h)
        y = jnp.dot(h.astype(w2t_ref.dtype), w2t_ref[0, 0],
                    preferred_element_type=jnp.float32)
        o_ref[...] += we_ref[...] * y


# --------------------------------- forward -------------------------------------

def moe_forward(params, x, *, temperature, tm=None, th=None,
                compute_dtype=jnp.bfloat16, weights_resident=None,
                vmem_limit_bytes=None):
    B, T, C = x.shape
    E, H, C_w = params["w1"].shape
    assert C_w == C and params["w2t"].shape == (E, H, C)
    assert params["wg"].shape == (E, C)
    assert E >= 2, "top_k = min(2, num_experts); kernel assumes num_experts >= 2"
    N = B * T

    # Per-generation tuning: raise tm toward 512 on v6e (128 MiB VMEM), keep ~128 on v5e
    # (16 MiB scoped default, 128-wide MXU), and re-derive the VMEM budget /
    # vmem_limit_bytes on v7x (64 MiB physical).  Keep n_tiles >= 2 and even for v7x's
    # two TensorCores.
    if tm is None:
        tm = N if N <= 256 else 256
    if th is None:
        th = H if H <= 512 else 512
    assert N % tm == 0 and (tm % 8 == 0 or tm == N)
    assert H % th == 0 and (th % 8 == 0 or th == H)
    n_tiles = N // tm
    n_hk = H // th

    x2 = x.reshape(N, C)

    # Gating stays in f32; matmul weights/activations go to the bf16 compute dtype.
    # TODO(synk): in production store w1/w2t pre-cast so this convert isn't a per-forward op.
    wg = params["wg"].astype(jnp.float32)
    w1 = params["w1"].astype(compute_dtype).reshape(E, n_hk, th, C)
    w2t = params["w2t"].astype(compute_dtype).reshape(E, n_hk, th, C)
    x2c = x2.astype(compute_dtype)          # halves activation HBM traffic into the MLP

    # --- gating: logits -> top-2 on exp(shifted logits) -> renormalized combine weights
    gate_w = pl.pallas_call(
        functools.partial(_moe_gate_kernel, temperature=float(temperature)),
        out_shape=jax.ShapeDtypeStruct((N, E), jnp.float32),
        grid=(n_tiles,),
        in_specs=[pl.BlockSpec((tm, C), lambda i: (i, 0)),
                  pl.BlockSpec((E, C), lambda i: (0, 0))],
        out_specs=pl.BlockSpec((tm, E), lambda i: (i, 0)),
        compiler_params=pltpu.CompilerParams(dimension_semantics=("parallel",)),
    )(x2, wg)

    # --- block-level routing table: expert e active for tile i iff any token picked it
    #     (non-selected experts have exactly-zero combine weight, so skipping is exact).
    #     Flattened to 1-D int32 so the scalar-prefetch SMEM staging isn't lane-padded.
    flags = (jnp.max(gate_w.reshape(n_tiles, tm, E), axis=1) > 0.0)
    flags = flags.reshape(n_tiles * E).astype(jnp.int32)

    if weights_resident is None:
        weight_bytes = 2 * E * H * C * jnp.dtype(compute_dtype).itemsize   # w1 + w2t
        # x2 for conservative pipeline buffering; budget sized for the smallest target
        # generation's VMEM (v7x).
        weights_resident = 2 * weight_bytes <= (24 << 20)

    compiler_kwargs = dict(vmem_limit_bytes=vmem_limit_bytes)

    if weights_resident:
        # Expert weights land in VMEM once (constant index_map) -> HBM weight traffic is
        # exactly E*H*C per launch, and the flag skip really skips everything.
        out = pl.pallas_call(
            functools.partial(_moe_expert_resident_kernel, n_hk=n_hk),
            out_shape=jax.ShapeDtypeStruct((N, C), jnp.float32),
            grid_spec=pltpu.PrefetchScalarGridSpec(
                num_scalar_prefetch=1,
                grid=(n_tiles, E),
                in_specs=[pl.BlockSpec((tm, C), lambda i, e, f: (i, 0)),
                          pl.BlockSpec((E, n_hk, th, C), lambda i, e, f: (0, 0, 0, 0)),
                          pl.BlockSpec((E, n_hk, th, C), lambda i, e, f: (0, 0, 0, 0)),
                          pl.BlockSpec((tm, E), lambda i, e, f: (i, 0))],
                out_specs=pl.BlockSpec((tm, C), lambda i, e, f: (i, 0)),
            ),
            compiler_params=pltpu.CompilerParams(
                dimension_semantics=("parallel", "arbitrary"), **compiler_kwargs),
        )(flags, x2c, w1, w2t, gate_w)
    else:
        # Streaming fallback (weights larger than the VMEM budget).
        # TODO(synk): the long-term fix here is a sorted/grouped ragged matmul with
        # scalar-prefetched per-expert group offsets so weights stream once per expert.
        out = pl.pallas_call(
            _moe_expert_streaming_kernel,
            out_shape=jax.ShapeDtypeStruct((N, C), jnp.float32),
            grid_spec=pltpu.PrefetchScalarGridSpec(
                num_scalar_prefetch=1,
                grid=(n_tiles, E, n_hk),
                in_specs=[pl.BlockSpec((tm, C), lambda i, e, h, f: (i, 0)),
                          pl.BlockSpec((1, 1, th, C), lambda i, e, h, f: (e, h, 0, 0)),
                          pl.BlockSpec((1, 1, th, C), lambda i, e, h, f: (e, h, 0, 0)),
                          pl.BlockSpec((tm, E), lambda i, e, h, f: (i, 0))],
                out_specs=pl.BlockSpec((tm, C), lambda i, e, h, f: (i, 0)),
                scratch_shapes=[pltpu.VMEM((tm, 1), jnp.float32)]),
            compiler_params=pltpu.CompilerParams(
                dimension_semantics=("parallel", "arbitrary", "arbitrary"),
                **compiler_kwargs),
        )(flags, x2c, w1, w2t, gate_w)

    return out.reshape(B, T, C)


# --------------------------- pure-JAX reference ---------------------------------

def moe_reference(params, x, *, temperature):
    """Pure-JAX f32 mirror of the PyTorch MoE forward (per-token top-2 routing)."""
    B, T, C = x.shape
    E = params["wg"].shape[0]
    N = B * T
    hp = lax.Precision.HIGHEST

    xt = x.reshape(N, C)
    logits = jnp.dot(xt, params["wg"].T, precision=hp)
    probs = jax.nn.softmax(logits / temperature, axis=-1)
    top_k = min(2, E)
    top_v, top_i = lax.top_k(probs, top_k)
    top_v = top_v / jnp.sum(top_v, axis=-1, keepdims=True)

    h = jnp.einsum("nc,ehc->enh", xt, params["w1"], precision=hp)
    h = jax.nn.gelu(h, approximate=False)                    # torch.nn.GELU() exact
    y_all = jnp.einsum("enh,ehc->enc", h, params["w2t"], precision=hp)

    rows = jnp.arange(N)
    out = jnp.zeros_like(xt)
    for k in range(top_k):
        out = out + y_all[top_i[:, k], rows, :] * top_v[:, k][:, None]
    return out.reshape(B, T, C)


# ------------------------------- params init ------------------------------------

def init_params(key, n_embd, num_experts):
    """PyTorch nn.Linear-style U(-1/sqrt(fan_in), +1/sqrt(fan_in)) init, bias=False."""
    H = 4 * n_embd
    kg, k1, k2 = jax.random.split(key, 3)
    bc = 1.0 / math.sqrt(n_embd)
    bh = 1.0 / math.sqrt(H)
    return {
        "wg":  jax.random.uniform(kg, (num_experts, n_embd), jnp.float32, -bc, bc),
        "w1":  jax.random.uniform(k1, (num_experts, H, n_embd), jnp.float32, -bc, bc),
        # fc2.weight stored transposed once at init ((H, C) per expert) so kernels never
        # materialize a transposed weight copy at forward time.
        "w2t": jax.random.uniform(k2, (num_experts, H, n_embd), jnp.float32, -bh, bh),
    }


# ---------------------------------- main -----------------------------------------

if __name__ == "__main__":
    B, T, n_embd, num_experts = 2, 8, 32, 4     # N = 16 tokens, H = 128, top_k = 2
    temperature = 1.5                           # config.moe_temperature

    key = jax.random.PRNGKey(0)
    pkey, xkey = jax.random.split(key)
    params = init_params(pkey, n_embd, num_experts)
    x = jax.random.normal(xkey, (B, T, n_embd), dtype=jnp.float32)

    y_ref = moe_reference(params, x, temperature=temperature)

    def run_and_check(name, tol, **kw):
        fwd = jax.jit(functools.partial(moe_forward, temperature=temperature,
                                        tm=8, th=64, **kw))
        y = jax.block_until_ready(fwd(params, x))
        assert y.shape == (B, T, n_embd)
        assert bool(jnp.all(jnp.isfinite(y))), name
        err = float(jnp.max(jnp.abs(y - y_ref)))
        assert err <= tol, (name, err)
        return err

    # structural check at full precision (tight tolerance)
    run_and_check("f32_resident", 5e-3,
                  compute_dtype=jnp.float32, weights_resident=True)
    # production path: bf16 MXU inputs, VMEM-resident expert weights
    run_and_check("bf16_resident", 5e-2,
                  compute_dtype=jnp.bfloat16, weights_resident=True)
    # streaming fallback path (weights too large for VMEM)
    run_and_check("bf16_streaming", 5e-2,
                  compute_dtype=jnp.bfloat16, weights_resident=False)

    print("KERNEL_OK")
</pallas_src>

<mosaic_0001>
module attributes {stable_mosaic.version = 11 : i64} {
  func.func @_moe_gate_kernel(%arg0: i32, %arg1: memref<8x32xf32, #tpu.memory_space<vmem>>, %arg2: memref<4x32xf32, #tpu.memory_space<vmem>>, %arg3: memref<8x4xf32, #tpu.memory_space<vmem>>) attributes {dimension_semantics = [#tpu.dimension_semantics<parallel>], iteration_bounds = array<i64: 2>, scalar_prefetch = 0 : i64, scratch_operands = 0 : i64, tpu.core_type = #tpu.core_type<tc>, window_params = [{transform_indices = @transform_0, window_bounds = array<i64: 8, 32>}, {pipeline_mode = #tpu.pipeline_mode<synchronous>, transform_indices = @transform_1, window_bounds = array<i64: 4, 32>}, {transform_indices = @transform_2, window_bounds = array<i64: 8, 4>}]} {
    %c0 = arith.constant 0 : index
    %c0_0 = arith.constant 0 : index
    %0 = vector.load %arg1[%c0, %c0_0] : memref<8x32xf32, #tpu.memory_space<vmem>>, vector<8x32xf32>
    %c0_1 = arith.constant 0 : index
    %c0_2 = arith.constant 0 : index
    %1 = vector.load %arg2[%c0_1, %c0_2] : memref<4x32xf32, #tpu.memory_space<vmem>>, vector<4x32xf32>
    %cst = arith.constant dense<0.000000e+00> : vector<8x4xf32>
    %2 = tpu.matmul %0, %1, %cst {dimension_numbers = #tpu.dot_dimension_numbers<[1], [1], [0], [0], [0, 0, 1, 0], [], []>} : vector<8x32xf32>, vector<4x32xf32>, vector<8x4xf32> -> vector<8x4xf32>
    %cst_3 = arith.constant 0.666666686 : f32
    %3 = vector.broadcast %cst_3 : f32 to vector<8x4xf32>
    %4 = arith.mulf %2, %3 : vector<8x4xf32>
    %cst_4 = arith.constant dense<0xFF800000> : vector<8xf32>
    %5 = vector.multi_reduction <maximumf>, %4, %cst_4 [1] : vector<8x4xf32> to vector<8xf32>
    %6 = vector.shape_cast %5 : vector<8xf32> to vector<8x1xf32>
    %7 = vector.broadcast %6 : vector<8x1xf32> to vector<8x4xf32>
    %8 = arith.subf %4, %7 : vector<8x4xf32>
    %9 = math.exp %8 : vector<8x4xf32>
    %10 = tpu.iota {dimensions = array<i32: 1>} : vector<8x4xi32>
    %11 = arith.sitofp %10 : vector<8x4xi32> to vector<8x4xf32>
    %cst_5 = arith.constant dense<0xFF800000> : vector<8xf32>
    %12 = vector.multi_reduction <maximumf>, %9, %cst_5 [1] : vector<8x4xf32> to vector<8xf32>
    %13 = vector.shape_cast %12 : vector<8xf32> to vector<8x1xf32>
    %14 = vector.broadcast %13 : vector<8x1xf32> to vector<8x4xf32>
    %15 = arith.cmpf oeq, %9, %14 : vector<8x4xf32>
    %cst_6 = arith.constant 4.000000e+00 : f32
    %16 = vector.broadcast %cst_6 : f32 to vector<8x4xf32>
    %17 = arith.select %15, %11, %16 : vector<8x4xi1>, vector<8x4xf32>
    %cst_7 = arith.constant dense<0x7F800000> : vector<8xf32>
    %18 = vector.multi_reduction <minimumf>, %17, %cst_7 [1] : vector<8x4xf32> to vector<8xf32>
    %19 = vector.shape_cast %18 : vector<8xf32> to vector<8x1xf32>
    %20 = vector.broadcast %19 : vector<8x1xf32> to vector<8x4xf32>
    %21 = arith.cmpf oeq, %11, %20 : vector<8x4xf32>
    %cst_8 = arith.constant -1.000000e+00 : f32
    %22 = vector.broadcast %cst_8 : f32 to vector<8x4xf32>
    %23 = arith.select %21, %22, %9 : vector<8x4xi1>, vector<8x4xf32>
    %cst_9 = arith.constant dense<0xFF800000> : vector<8xf32>
    %24 = vector.multi_reduction <maximumf>, %23, %cst_9 [1] : vector<8x4xf32> to vector<8xf32>
    %25 = vector.shape_cast %24 : vector<8xf32> to vector<8x1xf32>
    %26 = vector.broadcast %25 : vector<8x1xf32> to vector<8x4xf32>
    %27 = arith.cmpf oeq, %23, %26 : vector<8x4xf32>
    %cst_10 = arith.constant 4.000000e+00 : f32
    %28 = vector.broadcast %cst_10 : f32 to vector<8x4xf32>
    %29 = arith.select %27, %11, %28 : vector<8x4xi1>, vector<8x4xf32>
    %cst_11 = arith.constant dense<0x7F800000> : vector<8xf32>
    %30 = vector.multi_reduction <minimumf>, %29, %cst_11 [1] : vector<8x4xf32> to vector<8xf32>
    %31 = vector.shape_cast %30 : vector<8xf32> to vector<8x1xf32>
    %32 = vector.broadcast %31 : vector<8x1xf32> to vector<8x4xf32>
    %33 = arith.cmpf oeq, %11, %32 : vector<8x4xf32>
    %cst_12 = arith.constant 0.000000e+00 : f32
    %34 = vector.shape_cast %13 : vector<8x1xf32> to vector<8x1xf32>
    %35 = vector.broadcast %34 : vector<8x1xf32> to vector<8x4xf32>
    %36 = vector.broadcast %cst_12 : f32 to vector<8x4xf32>
    %37 = arith.select %21, %35, %36 : vector<8x4xi1>, vector<8x4xf32>
    %cst_13 = arith.constant 0.000000e+00 : f32
    %38 = vector.shape_cast %25 : vector<8x1xf32> to vector<8x1xf32>
    %39 = vector.broadcast %38 : vector<8x1xf32> to vector<8x4xf32>
    %40 = vector.broadcast %cst_13 : f32 to vector<8x4xf32>
    %41 = arith.select %33, %39, %40 : vector<8x4xi1>, vector<8x4xf32>
    %42 = arith.addf %37, %41 : vector<8x4xf32>
    %43 = arith.addf %13, %25 : vector<8x1xf32>
    %44 = vector.broadcast %43 : vector<8x1xf32> to vector<8x4xf32>
    %45 = arith.divf %42, %44 : vector<8x4xf32>
    %c0_14 = arith.constant 0 : index
    %c0_15 = arith.constant 0 : index
    %46 = vector.load %arg3[%c0_14, %c0_15] : memref<8x4xf32, #tpu.memory_space<vmem>>, vector<8x4xf32>
    tpu.vector_store %arg3[%c0_14, %c0_15], %45 {strides = array<i32>} : memref<8x4xf32, #tpu.memory_space<vmem>>, vector<8x4xf32>,
    return
  }
  func.func @transform_0(%arg0: i32) -> (i32, i32) {
    %c0_i32 = arith.constant 0 : i32
    %c0_i32_0 = arith.constant 0 : i32
    return %arg0, %c0_i32 : i32, i32
  }
  func.func @transform_1(%arg0: i32) -> (i32, i32) {
    %c0_i32 = arith.constant 0 : i32
    %c0_i32_0 = arith.constant 0 : i32
    %c0_i32_1 = arith.constant 0 : i32
    return %c0_i32, %c0_i32_0 : i32, i32
  }
  func.func @transform_2(%arg0: i32) -> (i32, i32) {
    %c0_i32 = arith.constant 0 : i32
    %c0_i32_0 = arith.constant 0 : i32
    return %arg0, %c0_i32 : i32, i32
  }
}

module attributes {stable_mosaic.version = 11 : i64} {
  func.func @_moe_expert_resident_kernel(%arg0: i32, %arg1: i32, %arg2: memref<8xi32, #tpu.memory_space<smem>>, %arg3: memref<8x32xf32, #tpu.memory_space<vmem>>, %arg4: memref<4x2x64x32xf32, #tpu.memory_space<vmem>>, %arg5: memref<4x2x64x32xf32, #tpu.memory_space<vmem>>, %arg6: memref<8x4xf32, #tpu.memory_space<vmem>>, %arg7: memref<8x32xf32, #tpu.memory_space<vmem>>) attributes {dimension_semantics = [#tpu.dimension_semantics<parallel>, #tpu.dimension_semantics<arbitrary>], iteration_bounds = array<i64: 2, 4>, scalar_prefetch = 1 : i64, scratch_operands = 0 : i64, tpu.core_type = #tpu.core_type<tc>, window_params = [{transform_indices = @transform_0, window_bounds = array<i64: 8, 32>}, {pipeline_mode = #tpu.pipeline_mode<synchronous>, transform_indices = @transform_1, window_bounds = array<i64: 4, 2, 64, 32>}, {pipeline_mode = #tpu.pipeline_mode<synchronous>, transform_indices = @transform_2, window_bounds = array<i64: 4, 2, 64, 32>}, {transform_indices = @transform_3, window_bounds = array<i64: 8, 4>}, {transform_indices = @transform_4, window_bounds = array<i64: 8, 32>}]} {
    %c0_i32 = arith.constant 0 : i32
    %0 = arith.cmpi eq, %arg1, %c0_i32 : i32
    %1 = arith.extui %0 : i1 to i32
    %c0_i32_0 = arith.constant 0 : i32
    %2 = arith.cmpi ne, %1, %c0_i32_0 : i32
    scf.if %2 {
      %cst = arith.constant 0.000000e+00 : f32
      %10 = vector.broadcast %cst : f32 to vector<8x32xf32>
      %c0 = arith.constant 0 : index
      %c0_3 = arith.constant 0 : index
      %11 = vector.load %arg7[%c0, %c0_3] : memref<8x32xf32, #tpu.memory_space<vmem>>, vector<8x32xf32>
      tpu.vector_store %arg7[%c0, %c0_3], %10 {strides = array<i32>} : memref<8x32xf32, #tpu.memory_space<vmem>>, vector<8x32xf32>,
    } else {
    }
    %c4_i32 = arith.constant 4 : i32
    %3 = arith.muli %arg0, %c4_i32 : i32
    %4 = arith.addi %3, %arg1 : i32
    %5 = arith.index_cast %4 : i32 to index
    %6 = memref.load %arg2[%5] : memref<8xi32, #tpu.memory_space<smem>>
    %c0_i32_1 = arith.constant 0 : i32
    %7 = arith.cmpi ne, %6, %c0_i32_1 : i32
    %8 = arith.extui %7 : i1 to i32
    %c0_i32_2 = arith.constant 0 : i32
    %9 = arith.cmpi ne, %8, %c0_i32_2 : i32
    scf.if %9 {
      %c0 = arith.constant 0 : index
      %c0_3 = arith.constant 0 : index
      %10 = vector.load %arg3[%c0, %c0_3] : memref<8x32xf32, #tpu.memory_space<vmem>>, vector<8x32xf32>
      %11 = tpu.iota {dimensions = array<i32: 1>} : vector<8x4xi32>
      %12 = vector.broadcast %arg1 : i32 to vector<8x4xi32>
      %13 = arith.cmpi eq, %11, %12 : vector<8x4xi32>
      %c0_4 = arith.constant 0 : index
      %c0_5 = arith.constant 0 : index
      %14 = vector.load %arg6[%c0_4, %c0_5] : memref<8x4xf32, #tpu.memory_space<vmem>>, vector<8x4xf32>
      %cst = arith.constant 0.000000e+00 : f32
      %15 = vector.broadcast %cst : f32 to vector<8x4xf32>
      %16 = arith.select %13, %14, %15 : vector<8x4xi1>, vector<8x4xf32>
      %cst_6 = arith.constant dense<0.000000e+00> : vector<8xf32>
      %17 = vector.multi_reduction <add>, %16, %cst_6 [1] : vector<8x4xf32> to vector<8xf32>
      %18 = vector.shape_cast %17 : vector<8xf32> to vector<8x1xf32>
      %cst_7 = arith.constant 0.000000e+00 : f32
      %19 = vector.broadcast %cst_7 : f32 to vector<8x32xf32>
      %c0_i32_8 = arith.constant 0 : i32
      %20 = arith.index_cast %arg1 : i32 to index
      %21 = arith.index_cast %c0_i32_8 : i32 to index
      %c0_9 = arith.constant 0 : index
      %c0_10 = arith.constant 0 : index
      %22 = vector.load %arg4[%20, %21, %c0_9, %c0_10] : memref<4x2x64x32xf32, #tpu.memory_space<vmem>>, vector<1x1x64x32xf32>
      %23 = vector.shape_cast %22 : vector<1x1x64x32xf32> to vector<64x32xf32>
      %cst_11 = arith.constant dense<0.000000e+00> : vector<8x64xf32>
      %24 = tpu.matmul %10, %23, %cst_11 {dimension_numbers = #tpu.dot_dimension_numbers<[1], [1], [0], [0], [0, 0, 1, 0], [], []>} : vector<8x32xf32>, vector<64x32xf32>, vector<8x64xf32> -> vector<8x64xf32>
      %cst_12 = arith.constant 5.000000e-01 : f32
      %25 = vector.broadcast %cst_12 : f32 to vector<8x64xf32>
      %26 = arith.mulf %25, %24 : vector<8x64xf32>
      %cst_13 = arith.constant 0.707106769 : f32
      %27 = vector.broadcast %cst_13 : f32 to vector<8x64xf32>
      %28 = arith.mulf %24, %27 : vector<8x64xf32>
      %29 = math.absf %28 : vector<8x64xf32>
      %cst_14 = arith.constant 0.327591091 : f32
      %30 = vector.broadcast %cst_14 : f32 to vector<8x64xf32>
      %31 = arith.mulf %30, %29 : vector<8x64xf32>
      %cst_15 = arith.constant 1.000000e+00 : f32
      %32 = vector.broadcast %cst_15 : f32 to vector<8x64xf32>
      %33 = arith.addf %32, %31 : vector<8x64xf32>
      %cst_16 = arith.constant 1.000000e+00 : f32
      %34 = vector.broadcast %cst_16 : f32 to vector<8x64xf32>
      %35 = arith.divf %34, %33 : vector<8x64xf32>
      %cst_17 = arith.constant 1.06140542 : f32
      %36 = vector.broadcast %cst_17 : f32 to vector<8x64xf32>
      %37 = arith.mulf %36, %35 : vector<8x64xf32>
      %cst_18 = arith.constant -1.45315206 : f32
      %38 = vector.broadcast %cst_18 : f32 to vector<8x64xf32>
      %39 = arith.addf %37, %38 : vector<8x64xf32>
      %40 = arith.mulf %39, %35 : vector<8x64xf32>
      %cst_19 = arith.constant 1.42141378 : f32
      %41 = vector.broadcast %cst_19 : f32 to vector<8x64xf32>
      %42 = arith.addf %40, %41 : vector<8x64xf32>
      %43 = arith.mulf %42, %35 : vector<8x64xf32>
      %cst_20 = arith.constant -0.284496725 : f32
      %44 = vector.broadcast %cst_20 : f32 to vector<8x64xf32>
      %45 = arith.addf %43, %44 : vector<8x64xf32>
      %46 = arith.mulf %45, %35 : vector<8x64xf32>
      %cst_21 = arith.constant 0.254829586 : f32
      %47 = vector.broadcast %cst_21 : f32 to vector<8x64xf32>
      %48 = arith.addf %46, %47 : vector<8x64xf32>
      %49 = arith.mulf %48, %35 : vector<8x64xf32>
      %cst_22 = arith.constant 0.000000e+00 : f32
      %50 = vector.broadcast %cst_22 : f32 to vector<8x64xf32>
      %51 = arith.subf %50, %29 : vector<8x64xf32>
      %52 = arith.mulf %51, %29 : vector<8x64xf32>
      %53 = math.exp %52 : vector<8x64xf32>
      %54 = arith.mulf %49, %53 : vector<8x64xf32>
      %cst_23 = arith.constant 1.000000e+00 : f32
      %55 = vector.broadcast %cst_23 : f32 to vector<8x64xf32>
      %56 = arith.subf %55, %54 : vector<8x64xf32>
      %cst_24 = arith.constant 0.000000e+00 : f32
      %57 = vector.broadcast %cst_24 : f32 to vector<8x64xf32>
      %58 = arith.cmpf oge, %28, %57 : vector<8x64xf32>
      %cst_25 = arith.constant 0.000000e+00 : f32
      %59 = vector.broadcast %cst_25 : f32 to vector<8x64xf32>
      %60 = arith.subf %59, %56 : vector<8x64xf32>
      %61 = arith.select %58, %56, %60 : vector<8x64xi1>, vector<8x64xf32>
      %cst_26 = arith.constant 1.000000e+00 : f32
      %62 = vector.broadcast %cst_26 : f32 to vector<8x64xf32>
      %63 = arith.addf %62, %61 : vector<8x64xf32>
      %64 = arith.mulf %26, %63 : vector<8x64xf32>
      %65 = arith.index_cast %arg1 : i32 to index
      %66 = arith.index_cast %c0_i32_8 : i32 to index
      %c0_27 = arith.constant 0 : index
      %c0_28 = arith.constant 0 : index
      %67 = vector.load %arg5[%65, %66, %c0_27, %c0_28] : memref<4x2x64x32xf32, #tpu.memory_space<vmem>>, vector<1x1x64x32xf32>
      %68 = vector.shape_cast %67 : vector<1x1x64x32xf32> to vector<64x32xf32>
      %cst_29 = arith.constant dense<0.000000e+00> : vector<8x32xf32>
      %69 = tpu.matmul %64, %68, %cst_29 {dimension_numbers = #tpu.dot_dimension_numbers<[1], [0], [0], [1], [0, 0, 1, 1], [], []>} : vector<8x64xf32>, vector<64x32xf32>, vector<8x32xf32> -> vector<8x32xf32>
      %70 = arith.addf %19, %69 : vector<8x32xf32>
      %c1_i32 = arith.constant 1 : i32
      %71 = arith.index_cast %arg1 : i32 to index
      %72 = arith.index_cast %c1_i32 : i32 to index
      %c0_30 = arith.constant 0 : index
      %c0_31 = arith.constant 0 : index
      %73 = vector.load %arg4[%71, %72, %c0_30, %c0_31] : memref<4x2x64x32xf32, #tpu.memory_space<vmem>>, vector<1x1x64x32xf32>
      %74 = vector.shape_cast %73 : vector<1x1x64x32xf32> to vector<64x32xf32>
      %cst_32 = arith.constant dense<0.000000e+00> : vector<8x64xf32>
      %75 = tpu.matmul %10, %74, %cst_32 {dimension_numbers = #tpu.dot_dimension_numbers<[1], [1], [0], [0], [0, 0, 1, 0], [], []>} : vector<8x32xf32>, vector<64x32xf32>, vector<8x64xf32> -> vector<8x64xf32>
      %cst_33 = arith.constant 5.000000e-01 : f32
      %76 = vector.broadcast %cst_33 : f32 to vector<8x64xf32>
      %77 = arith.mulf %76, %75 : vector<8x64xf32>
      %cst_34 = arith.constant 0.707106769 : f32
      %78 = vector.broadcast %cst_34 : f32 to vector<8x64xf32>
      %79 = arith.mulf %75, %78 : vector<8x64xf32>
      %80 = math.absf %79 : vector<8x64xf32>
      %cst_35 = arith.constant 0.327591091 : f32
      %81 = vector.broadcast %cst_35 : f32 to vector<8x64xf32>
      %82 = arith.mulf %81, %80 : vector<8x64xf32>
      %cst_36 = arith.constant 1.000000e+00 : f32
      %83 = vector.broadcast %cst_36 : f32 to vector<8x64xf32>
      %84 = arith.addf %83, %82 : vector<8x64xf32>
      %cst_37 = arith.constant 1.000000e+00 : f32
      %85 = vector.broadcast %cst_37 : f32 to vector<8x64xf32>
      %86 = arith.divf %85, %84 : vector<8x64xf32>
      %cst_38 = arith.constant 1.06140542 : f32
      %87 = vector.broadcast %cst_38 : f32 to vector<8x64xf32>
      %88 = arith.mulf %87, %86 : vector<8x64xf32>
      %cst_39 = arith.constant -1.45315206 : f32
      %89 = vector.broadcast %cst_39 : f32 to vector<8x64xf32>
      %90 = arith.addf %88, %89 : vector<8x64xf32>
      %91 = arith.mulf %90, %86 : vector<8x64xf32>
      %cst_40 = arith.constant 1.42141378 : f32
      %92 = vector.broadcast %cst_40 : f32 to vector<8x64xf32>
      %93 = arith.addf %91, %92 : vector<8x64xf32>
      %94 = arith.mulf %93, %86 : vector<8x64xf32>
      %cst_41 = arith.constant -0.284496725 : f32
      %95 = vector.broadcast %cst_41 : f32 to vector<8x64xf32>
      %96 = arith.addf %94, %95 : vector<8x64xf32>
      %97 = arith.mulf %96, %86 : vector<8x64xf32>
      %cst_42 = arith.constant 0.254829586 : f32
      %98 = vector.broadcast %cst_42 : f32 to vector<8x64xf32>
      %99 = arith.addf %97, %98 : vector<8x64xf32>
      %100 = arith.mulf %99, %86 : vector<8x64xf32>
      %cst_43 = arith.constant 0.000000e+00 : f32
      %101 = vector.broadcast %cst_43 : f32 to vector<8x64xf32>
      %102 = arith.subf %101, %80 : vector<8x64xf32>
      %103 = arith.mulf %102, %80 : vector<8x64xf32>
      %104 = math.exp %103 : vector<8x64xf32>
      %105 = arith.mulf %100, %104 : vector<8x64xf32>
      %cst_44 = arith.constant 1.000000e+00 : f32
      %106 = vector.broadcast %cst_44 : f32 to vector<8x64xf32>
      %107 = arith.subf %106, %105 : vector<8x64xf32>
      %cst_45 = arith.constant 0.000000e+00 : f32
      %108 = vector.broadcast %cst_45 : f32 to vector<8x64xf32>
      %109 = arith.cmpf oge, %79, %108 : vector<8x64xf32>
      %cst_46 = arith.constant 0.000000e+00 : f32
      %110 = vector.broadcast %cst_46 : f32 to vector<8x64xf32>
      %111 = arith.subf %110, %107 : vector<8x64xf32>
      %112 = arith.select %109, %107, %111 : vector<8x64xi1>, vector<8x64xf32>
      %cst_47 = arith.constant 1.000000e+00 : f32
      %113 = vector.broadcast %cst_47 : f32 to vector<8x64xf32>
      %114 = arith.addf %113, %112 : vector<8x64xf32>
      %115 = arith.mulf %77, %114 : vector<8x64xf32>
      %116 = arith.index_cast %arg1 : i32 to index
      %117 = arith.index_cast %c1_i32 : i32 to index
      %c0_48 = arith.constant 0 : index
      %c0_49 = arith.constant 0 : index
      %118 = vector.load %arg5[%116, %117, %c0_48, %c0_49] : memref<4x2x64x32xf32, #tpu.memory_space<vmem>>, vector<1x1x64x32xf32>
      %119 = vector.shape_cast %118 : vector<1x1x64x32xf32> to vector<64x32xf32>
      %cst_50 = arith.constant dense<0.000000e+00> : vector<8x32xf32>
      %120 = tpu.matmul %115, %119, %cst_50 {dimension_numbers = #tpu.dot_dimension_numbers<[1], [0], [0], [1], [0, 0, 1, 1], [], []>} : vector<8x64xf32>, vector<64x32xf32>, vector<8x32xf32> -> vector<8x32xf32>
      %121 = arith.addf %70, %120 : vector<8x32xf32>
      %c2_i32 = arith.constant 2 : i32
      %c0_51 = arith.constant 0 : index
      %c0_52 = arith.constant 0 : index
      %122 = vector.load %arg7[%c0_51, %c0_52] : memref<8x32xf32, #tpu.memory_space<vmem>>, vector<8x32xf32>
      %123 = vector.broadcast %18 : vector<8x1xf32> to vector<8x32xf32>
      %124 = arith.mulf %123, %121 : vector<8x32xf32>
      %125 = arith.addf %122, %124 : vector<8x32xf32>
      %c0_53 = arith.constant 0 : index
      %c0_54 = arith.constant 0 : index
      %126 = vector.load %arg7[%c0_53, %c0_54] : memref<8x32xf32, #tpu.memory_space<vmem>>, vector<8x32xf32>
      tpu.vector_store %arg7[%c0_53, %c0_54], %125 {strides = array<i32>} : memref<8x32xf32, #tpu.memory_space<vmem>>, vector<8x32xf32>,
    } else {
    }
    return
  }
  func.func @transform_0(%arg0: i32, %arg1: i32, %arg2: memref<8xi32, #tpu.memory_space<smem>>) -> (i32, i32) {
    %c0_i32 = arith.constant 0 : i32
    %c0_i32_0 = arith.constant 0 : i32
    return %arg0, %c0_i32 : i32, i32
  }
  func.func @transform_1(%arg0: i32, %arg1: i32, %arg2: memref<8xi32, #tpu.memory_space<smem>>) -> (i32, i32, i32, i32) {
    %c0_i32 = arith.constant 0 : i32
    %c0_i32_0 = arith.constant 0 : i32
    %c0_i32_1 = arith.constant 0 : i32
    %c0_i32_2 = arith.constant 0 : i32
    %c0_i32_3 = arith.constant 0 : i32
    return %c0_i32, %c0_i32_0, %c0_i32_1, %c0_i32_2 : i32, i32, i32, i32
  }
  func.func @transform_2(%arg0: i32, %arg1: i32, %arg2: memref<8xi32, #tpu.memory_space<smem>>) -> (i32, i32, i32, i32) {
    %c0_i32 = arith.constant 0 : i32
    %c0_i32_0 = arith.constant 0 : i32
    %c0_i32_1 = arith.constant 0 : i32
    %c0_i32_2 = arith.constant 0 : i32
    %c0_i32_3 = arith.constant 0 : i32
    return %c0_i32, %c0_i32_0, %c0_i32_1, %c0_i32_2 : i32, i32, i32, i32
  }
  func.func @transform_3(%arg0: i32, %arg1: i32, %arg2: memref<8xi32, #tpu.memory_space<smem>>) -> (i32, i32) {
    %c0_i32 = arith.constant 0 : i32
    %c0_i32_0 = arith.constant 0 : i32
    return %arg0, %c0_i32 : i32, i32
  }
  func.func @transform_4(%arg0: i32, %arg1: i32, %arg2: memref<8xi32, #tpu.memory_space<smem>>) -> (i32, i32) {
    %c0_i32 = arith.constant 0 : i32
    %c0_i32_0 = arith.constant 0 : i32
    return %arg0, %c0_i32 : i32, i32
  }
}

</mosaic_0001>

<bundles_post_ra>
// kernel: moe_forward.2
= control target key start
LH: loop header
LB: loop body
LE: loop exit
PB: predicated region body
PF: predicated region fallthrough
CT: control target
= control target key end

     0   :  { %7 = vsyncpa [#allocation3], 0  ;;  %s606_s0 = inlined_call_operand.hbm [shape: f32[16,32], index: 0, kind: input, shape index: {}]   ;;  %s607_s1 = inlined_call_operand.vmem [shape: f32[4,32], index: 1, kind: input, shape index: {}]   ;;  %s608_s2 = inlined_call_operand.vmem [shape: f32[16,4], index: 2, kind: output, shape index: {}]  }
   0x1   :  { %9 = vsyncpa [#allocation3 + $0x1], 0  ;;  %s488_s9 = smov 0   ;;  %s490_s10 = smov 0  }
   0x2   :  { %s492_s11 = smov 0   ;;  %s494_s12 = smov 0  }
   0x3 LB: > { %s507_s13 = sadd.s32 4294967295, %s468_s12   ;;  %s510_s14 = sadd.s32 1, %s468_s12   ;;  %s468_s12 = sphi %s494_s12, %s616_s12   ;;  %s464_s11 = sphi %s492_s11, %s615_s11   ;;  %s460_s10 = sphi %s490_s10, %s614_s10   ;;  %s456_s9 = sphi %s488_s9, %s613_s9  }
   0x4   : > { %s19_s15 = ssub.s32 %s468_s12, %s510_s14  ;;  %s22_s16 = sadd.s32 1, %s464_s11 }
   0x5   : > { %p20_p0 = scmp.eq.s32.totalorder %s19_s15, 0  ;;  %p29_p1 = scmp.ne.s32.totalorder %s464_s11, %s460_s10 }
   0x6   : > { %p30_p2 = scmp.eq.s32.totalorder %s468_s12, 0  ;;  %p35_p3 = scmp.ne.s32.totalorder %s460_s10, %s456_s9 }
   0x7   : > { %s520_s17 = scalar_select %p20_p0, %s464_s11, %s22_s16  }
   0x8   : > { %p31_p4 = por %p30_p2, %p29_p1  ;;  %p36_p5 = scmp.eq.s32.totalorder %s507_s13, 0 }
   0x9   : > { %p365_p6 = scmp.lt.s32.totalorder %s468_s12, 2  ;;  %s109_s19 = sand.u32 1, %s464_s11  }
   0xa   : > { %p524_p7 = por %p36_p5, %p35_p3  ;;  %s343_s20 = sshll.u32 %s109_s19, 3 }
   0xb   : > { %s344_s21 = sshll.u32 %s468_s12, 7  ;;  %s113_s25 = scalar_lea.vmem [#allocation2], %s343_s20 }
   0xc   : > { %s533_s24 = scalar_lea.hbm %s606_s0, %s344_s21  ;;  %s120_s26 = sshll.u32 %s113_s25, 4  ;;  %s535_s26 = int_to_ptr.vmem [resolvable:$true] %s120_s26 }
   0xd   : > { %p537_p8 = pnand %p365_p6, %p31_p4  ;;  %s110_s28 = scalar_lea.sflag [#allocation3], %s109_s19 }
   0xe   : > { %s404_s29 = scalar_lea.hbm %s533_s24, 128  ;;  %s409_s4 = scalar_lea.hbm %s606_s0, 256 }
   0xf   : > { %p405_p11 = scmp.ne.s32.totalorder %s533_s24, %s404_s29  ;;  %p406_p12 = pneg %p537_p8 }
  0x10   : > { %p410_p1 = scmp.lt.u32.totalorder %s533_s24, %s606_s0  ;;  %p411_p2 = scmp.lt.u32.totalorder %s409_s4, %s404_s29 }
  0x11   : > { %p407_p13 = pnand %p406_p12, %p405_p11  ;;  %p413_p4 = scmp.lt.u32.totalorder %s404_s29, %s533_s24 }
  0x12   : > { %p412_p3 = por %p411_p2, %p410_p1 }
  0x13   : > { %p408_p0 = pneg %p407_p13 }
  0x14   : > { %p414_p5 = por %p413_p4, %p412_p3 }
  0x16   : > { %p415_p6 = pnand %p414_p5, %p408_p0 }
  0x18   : > { %418 = shalt.err (!%p415_p6)
}
  0x19   : > { %s419_s7 = scalar_lea.vmem %s535_s26, 128  ;;  %s470_s8 = smov [#allocation2]  }
  0x1a   : > { %p420_p11 = scmp.ne.s32.totalorder %s535_s26, %s419_s7  ;;  %s424_s9 = sshll.u32 %s470_s8, 4  ;;  %s425_s9 = int_to_ptr.vmem [resolvable:$false] %s424_s9 }
  0x1b   : > { %s426_s15 = scalar_lea.vmem %s425_s9, 256  ;;  %p427_p10 = scmp.lt.s32.totalorder %s535_s26, %s425_s9 }
  0x1c   : > { %p422_p13 = pnand %p420_p11, %p406_p12  ;;  %p428_p1 = scmp.lt.s32.totalorder %s426_s15, %s419_s7 }
  0x1e   : > { %p423_p9 = pneg %p422_p13  ;;  %p429_p2 = por %p428_p1, %p427_p10 }
  0x20   : > { %p430_p3 = pnand %p429_p2, %p423_p9 }
  0x22   : > { %433 = shalt.err (!%p430_p3)
}
  0x23   : > { %364 = dma.hbm_to_vmem [thread:$0]  (!%p537_p8), %s533_s24, 128, %s535_s26, %s110_s28  }
  0x24   : > { %p611_p0 = scmp.lt.s32.totalorder %s468_s12, 3  ;;  %p612_p4 = scmp.ge.s32.totalorder %s468_s12, 1 }
  0x26   : > { %p126_p12 = pnand %p612_p4, %p611_p0 }
  0x27   : > { %s131_s16 = sand.u32 (!%p126_p12), 1, %s460_s10  }
  0x28   : > { %129 = sbr.rel (%p126_p12) target bundleno = 1010 (0x3f2), region = 28  ;;  %s346_s19 = sshll.u32 (!%p126_p12), %s131_s16, 3 }
  0x29   : > { %s132_s20 = scalar_lea.sflag (!%p126_p12), [#allocation3], %s131_s16  ;;  %s135_s21 = scalar_lea.vmem (!%p126_p12), [#allocation2], %s346_s19 }
  0x2f   : > { %451 = dma.done.wait (%p524_p7), %s132_s20, 128  }
  0x30   : > { %453 = vsyncadd (%p524_p7), %s132_s20, 4294967168  ;;  %v471_v0 = vmov 0.0   ;;  %vm472_vm0 = vmmov 0   ;;  %vm161_vm1 = vcmask 261120   ;;  %v160_v1 = vld [vmem:[%s607_s1] sm:$0xf]  ;;  %v246_v12 = vlaneseq }
  0x31   : > { %354 = vmatprep.subr.mxu0 %v471_v0  ;;  %356 = vmatprep.mubr.msk.f32.mxu0 %vm472_vm0, %v471_v0  ;;  %v159_v2 = vld [vmem:[%s135_s21] sm:$0xff]  ;;  %vm239_vm2 = vcmask 31744   ;;  %p155_p7 = scmp.lt.s32.totalorder %s507_s13, 1 }
  0x32   : > { %355 = vmatpush3.xpose.msk.msra.mxu0 %vm161_vm1, %v160_v1  ;;  %v247_v13 = vand.u32 127, %v246_v12 }
  0x33   : > { %s618_s13 = smov (!%p155_p7, %s507_s13), 1 }
  0x34   : > { %v248_v14 = vcvt.s32.f32 %v247_v13  ;;  %s347_s18 = sshll.u32 %s618_s13, 3 }
  0x35   : > { %357 = vmatmul.mubr.msk.f32.vlgmr.msra.gmra.mrb[0].mxu0 %vm161_vm1, %v159_v2  ;;  %s158_s25 = scalar_lea.vmem %s608_s2, %s347_s18 }
 0x108   : > { %v234_v3 = vpop.f32.mrb[0].mxu0 }
 0x109   : > { %v238_v4 = vmul.f32 0.6666667, %v234_v3  ;;  %v358_v5 = vpop.f32.mrb[1].mxu0 }
 0x10b   : > { %v240_v6 = vsel %vm239_vm2, %v238_v4, -inf }
 0x10c   : > { %241 = vmax.xlane.f32.xlu0 %v240_v6 }
 0x199   : > { %v242_v7 = vpop.xlane.xlu0 %241 }
 0x19a   : > { %v243_v8 = vsub.f32 %v238_v4, %v242_v7 }
 0x19c   : > { %v244_v9 = vmul.f32 1.442695, %v243_v8 }
 0x19e   : > { %400 = vpow2.f32 %v244_v9 }
 0x1a8   : > { %v401_v10 = vpop.eup %400 }
 0x1a9   : > { %v249_v11 = vsel %vm239_vm2, %v401_v10, -inf }
 0x1aa   : > { %250 = vmax.xlane.f32.xlu0 %v249_v11 }
 0x237   : > { %v251_v15 = vpop.xlane.xlu0 %250 }
 0x238   : > { %vm252_vm3 = vcmp.eq.f32.partialorder %v401_v10, %v251_v15 }
 0x239   : > { %v253_v16 = vsel %vm252_vm3, %v248_v14, 4.0 }
 0x23a   : > { %v254_v17 = vsel %vm239_vm2, %v253_v16, inf }
 0x23b   : > { %255 = vmin.xlane.f32.xlu1 %v254_v17 }
 0x2c8   : > { %v256_v18 = vpop.xlane.xlu1 %255 }
 0x2c9   : > { %vm257_vm4 = vcmp.eq.f32.partialorder %v248_v14, %v256_v18 }
 0x2ca   : > { %v258_v19 = vsel %vm257_vm4, -1.0, %v401_v10  ;;  %v268_v26 = vsel %vm257_vm4, %v251_v15, 0.0 }
 0x2cb   : > { %v259_v20 = vsel %vm239_vm2, %v258_v19, -inf }
 0x2cc   : > { %260 = vmax.xlane.f32.xlu1 %v259_v20 }
 0x359   : > { %v261_v21 = vpop.xlane.xlu1 %260 }
 0x35a   : > { %vm262_vm5 = vcmp.eq.f32.partialorder %v258_v19, %v261_v21  ;;  %v271_v24 = vadd.f32 %v261_v21, %v251_v15 }
 0x35b   : > { %v263_v22 = vsel %vm262_vm5, %v248_v14, 4.0 }
 0x35c   : > { %v264_v23 = vsel %vm239_vm2, %v263_v22, inf  ;;  %402 = vrcp.f32 %v271_v24 }
 0x35d   : > { %265 = vmin.xlane.f32.xlu0 %v264_v23 }
 0x366   : > { %v403_v29 = vpop.eup %402 }
 0x3ea   : > { %v266_v25 = vpop.xlane.xlu0 %265 }
 0x3eb   : > { %vm267_vm6 = vcmp.eq.f32.partialorder %v248_v14, %v266_v25 }
 0x3ec   : > { %v269_v27 = vsel %vm267_vm6, %v261_v21, 0.0 }
 0x3ed   : > { %v270_v28 = vadd.f32 %v269_v27, %v268_v26 }
 0x3ef   : > { %v273_v30 = vmul.f32 %v403_v29, %v270_v28 }
 0x3f1   : > { %274 = vst.msk [vmem:[%s158_s25] sm:$0xff] %vm239_vm2, %v273_v30 }
 0x3f2 PF: > { %p12_p8 = scmp.ge.s32.totalorder %s510_s14, 4   ;;  %s613_s9 = smov %s460_s10 }
 0x3f3   : > { %s614_s10 = smov %s464_s11  ;;  %s615_s11 = smov %s520_s17 }
 0x3f4   : > { %s616_s12 = smov %s510_s14  ;;  %14 = sbr.rel (!%p12_p8) target bundleno = 3 (0x3), region = 68 }
 0x3fb   :  { %294 = vsyncpa [#allocation3], 1 }
 0x3fc   :  { %296 = vsyncpa [#allocation3 + $0x1], 1 }

// kernel: moe_forward.3
= control target key start
LH: loop header
LB: loop body
LE: loop exit
PB: predicated region body
PF: predicated region fallthrough
CT: control target
= control target key end

     0   :  { %s1491_s0 = inlined_call_operand.vmem [shape: s32[8], index: 0, kind: input, shape index: {}]   ;;  %s1492_s1 = inlined_call_operand.vmem [shape: f32[16,32], index: 1, kind: input, shape index: {}]   ;;  %s1493_s2 = inlined_call_operand.vmem [shape: f32[4,2,64,32], index: 2, kind: input, shape index: {}]   ;;  %s1494_s3 = inlined_call_operand.vmem [shape: f32[4,2,64,32], index: 3, kind: input, shape index: {}]   ;;  %s1495_s4 = inlined_call_operand.vmem [shape: f32[16,4], index: 4, kind: input, shape index: {}]   ;;  %s1496_s5 = inlined_call_operand.hbm [shape: f32[16,32], index: 5, kind: output, shape index: {}]  }
   0x1   :  { %s10_s20 = sshll.u32 %s1491_s0, 4  ;;  %s11_s20 = int_to_ptr.vmem [resolvable:$true] %s10_s20 }
   0x2   :  { %s1101_s21 = scalar_lea.vmem %s11_s20, 16  ;;  %p1106_p1 = scmp.lt.s32.totalorder %s11_s20, %s11_s20 }
   0x3   :  { %p1102_p0 = scmp.ne.s32.totalorder %s11_s20, %s1101_s21  ;;  %p1107_p2 = scmp.lt.s32.totalorder %s1101_s21, %s1101_s21 }
   0x5   :  { %p1108_p3 = por %p1107_p2, %p1106_p1 }
   0x7   :  { %p1109_p4 = pnand %p1108_p3, %p1102_p0 }
   0x9   :  { %1112 = shalt.err (!%p1109_p4)  }
   0xa   :  { %s1211_s22 = smov [#allocation3]  }
   0xb   :  { %13 = dma.vmem_to_smem %s11_s20, 16, %s1211_s22, [#allocation2] }
   0xc   :  { %1173 = dma.done.wait [#allocation2], 16 }
   0xd   :  { %1174 = vsyncadd [#allocation2], 4294967280 }
   0xe   :  { %15 = sfence }
   0xf   :  { %16 = vsyncpa [#allocation5], 0 }
  0x10   :  { %18 = vsyncpa [#allocation5 + $0x1], 0  ;;  %s1250_s23 = smov 0   ;;  %s1252_s24 = smov 0  }
  0x11   :  { %s1254_s0 = smov 0   ;;  %s1256_s25 = smov 0  }
  0x12   :  { %s1258_s26 = smov 0   ;;  %s1260_s27 = smov 0  }
  0x13   :  { %s1262_s28 = smov 0   ;;  %s1264_s29 = smov 0  }
  0x14 LB: > { %s794_s30 = sadd.s32 4294967295, %s1209_s29   ;;  %s795_s6 = sadd.s32 4294967294, %s1209_s29   ;;  %s1209_s29 = sphi %s1264_s29, %s24_s29   ;;  %s1205_s28 = sphi %s1262_s28, %s1507_s28   ;;  %s1201_s27 = sphi %s1260_s27, %s1506_s27   ;;  %s1197_s26 = sphi %s1258_s26, %s1505_s26   ;;  %s1193_s25 = sphi %s1256_s25, %s1504_s25   ;;  %s1189_s0 = sphi %s1254_s0, %s1503_s0   ;;  %s1185_s24 = sphi %s1252_s24, %s1502_s24   ;;  %s1181_s23 = sphi %s1250_s23, %s1501_s23  }
  0x15   : > { %s33_s7 = sadd.s32 1, %s1201_s27  ;;  %s36_s8 = sadd.s32 1, %s1205_s28 }
  0x16   : > { %p34_p5 = scmp.ge.s32.totalorder %s33_s7, 4  ;;  %p147_p6 = scmp.ne.s32.totalorder %s1189_s0, %s1185_s24 }
  0x17   : > { %p148_p7 = scmp.eq.s32.totalorder %s794_s30, 7  ;;  %p153_p9 = scmp.ne.s32.totalorder %s1185_s24, %s1181_s23 }
  0x18   : > { %s1509_s7 = smov (%p34_p5, %s33_s7), 0  ;;  %s1511_s8 = smov (!%p34_p5, %s36_s8), %s1205_s28 }
  0x19   : > { %p1299_p8 = por %p148_p7, %p147_p6  ;;  %p38_p10 = scmp.ge.s32.totalorder %s1511_s8, 2 }
  0x1a   : > { %p154_p11 = scmp.eq.s32.totalorder %s795_s6, 7  ;;  %p798_p12 = scmp.ge.s32.totalorder %s1209_s29, 1 }
  0x1b   : > { %p192_p13 = scmp.lt.s32.totalorder %s1209_s29, 9  ;;  %s1513_s8 = smov (%p38_p10, %s1511_s8), 0 }
  0x1c   : > { %p1309_p0 = por %p154_p11, %p153_p9  ;;  %s134_s11 = ssub.s32 %s1205_s28, %s1513_s8 }
  0x1d   : > { %p193_p1 = pnand %p798_p12, %p192_p13  ;;  %s137_s12 = sadd.s32 1, %s1189_s0 }
  0x1e   : > { %p135_p2 = scmp.eq.s32.totalorder %s134_s11, 0  ;;  %s218_s14 = sand.u32 (!%p193_p1), 1, %s1185_s24  }
  0x1f   : > { %196 = sbr.rel (%p193_p1) target bundleno = 595 (0x253), region = 36  ;;  %p221_p3 = scmp.lt.s32.totalorder (!%p193_p1), %s1197_s26, 1 }
  0x20   : > { %s1317_s13 = scalar_select %p135_p2, %s1189_s0, %s137_s12  }
  0x21   : > { %s799_s15 = sshll.u32 (!%p193_p1), %s218_s14, 3  ;;  %p802_p4 = scmp.ne.s32.totalorder (!%p193_p1), %s1193_s25, 0 }
  0x22   : > { %s1334_s6 = scalar_lea.vmem (!%p193_p1), [#allocation4], %s799_s15 }
  0x26   : > { %s222_s16 = scalar_select %p221_p3, %s1197_s26, 1 }
  0x27   : > { %232 = sbr.rel (%p802_p4) target bundleno = 46 (0x2e), region = 40  ;;  %vm233_vm0 = vcmask (!%p802_p4), 261120   ;;  %v1212_v0 = vmov (!%p802_p4), 0.0  }
  0x28   : > { %s800_s17 = sshll.u32 %s222_s16, 3  ;;  %234 = vst.msk [vmem:[%s1334_s6] sm:$0xff] (!%p802_p4), %vm233_vm0, %v1212_v0 }
  0x29   : > { %s1327_s20 = scalar_lea.vmem %s1492_s1, %s800_s17  ;;  %s1332_s30 = scalar_lea.vmem %s1495_s4, %s800_s17 }
  0x2e PF: > { %s803_s11 = sshll.u32 %s1197_s26, 2 }
  0x2f   : > { %s236_s12 = sadd.s32 %s1193_s25, %s803_s11 }
  0x30   : > { %s237_s16 = sld [smem:[#allocation3 + %s236_s12]] }
  0x36   : > { %p804_p5 = scmp.eq.s32.totalorder %s237_s16, 0 }
  0x37   : > { %s805_s17 = sshll.u32 (!%p804_p5), %s1193_s25, 7  ;;  %vm263_vm1 = vcmask (!%p804_p5), 261120   ;;  %v1213_v1 = vmov (!%p804_p5), 0.0|0.0   ;;  %vm1214_vm3 = vmmov (!%p804_p5), 0   ;;  %v1215_v6 = vmov (!%p804_p5), 0.0   ;;  %v242_v28 = vld [vmem:[%s1327_s20] sm:$0xff] (!%p804_p5) }
  0x38   : > { %241 = sbr.rel (%p804_p5) target bundleno = 571 (0x23b), region = 44  ;;  %960 = vmatprep.subr.bf16.mxu0 (!%p804_p5), %v1213_v1  ;;  %976 = vmatprep.subr.bf16.mxu1 (!%p804_p5), %v1213_v1  ;;  %s1348_s19 = scalar_lea.vmem (!%p804_p5), %s1493_s2, %s805_s17  ;;  %vm1352_vm2 = vmpackc.low (!%p804_p5), %vm263_vm1, %vm263_vm1  ;;  %v243_v53 = vlaneseq (!%p804_p5)  ;;  %v245_v54 = vstv (!%p804_p5), %s1193_s25  ;;  %v247_v56 = vld [vmem:[%s1332_s30] sm:$0xff] (!%p804_p5)  ;;  %vm249_vm4 = vcmask (!%p804_p5), 31744   ;;  %vm537_vm8 = vcmask (!%p804_p5), 523264  }
  0x39   : > { %v255_v3 = vld [vmem:[%s1348_s19] sm:$0xff] (!%p804_p5)  ;;  %v256_v4 = vld [vmem:[%s1348_s19 + $0x8] sm:$0xff] (!%p804_p5)  ;;  %900 = vmatprep.mubr.msk.f32.mxu0 (!%p804_p5), %vm1214_vm3, %v1215_v6  ;;  %919 = vmatprep.mubr.msk.f32.mxu1 (!%p804_p5), %vm1214_vm3, %v1215_v6  ;;  %v257_v10 = vld [vmem:[%s1348_s19 + $0x10] sm:$0xff] (!%p804_p5)  ;;  %s1408_s11 = scalar_lea.vmem (!%p804_p5), %s1494_s3, %s805_s17 }
  0x3a   : > { %v816_v5 = vld [vmem:[%s1348_s19 + $0x40] sm:$0xff] (!%p804_p5)  ;;  %v961_v7 = vpack.c.bf16 (!%p804_p5), %v256_v4, %v255_v3  ;;  %v817_v8 = vld [vmem:[%s1348_s19 + $0x48] sm:$0xff] (!%p804_p5)  ;;  %v258_v11 = vld [vmem:[%s1348_s19 + $0x18] sm:$0xff] (!%p804_p5)  ;;  %v244_v55 = vand.u32 (!%p804_p5), 127, %v243_v53 }
  0x3b   : > { %v977_v9 = vpack.c.bf16 (!%p804_p5), %v817_v8, %v816_v5  ;;  %v818_v12 = vld [vmem:[%s1348_s19 + $0x50] sm:$0xff] (!%p804_p5)  ;;  %v819_v13 = vld [vmem:[%s1348_s19 + $0x58] sm:$0xff] (!%p804_p5)  ;;  %v965_v14 = vpack.c.bf16 (!%p804_p5), %v258_v11, %v257_v10  ;;  %v259_v16 = vld [vmem:[%s1348_s19 + $0x20] sm:$0xff] (!%p804_p5) }
  0x3c   : > { %963 = vmatpush3.bf16.xpose.msk.msra.mxu0 (!%p804_p5), %vm1352_vm2, %v961_v7  ;;  %v981_v15 = vpack.c.bf16 (!%p804_p5), %v819_v13, %v818_v12  ;;  %v260_v17 = vld [vmem:[%s1348_s19 + $0x28] sm:$0xff] (!%p804_p5)  ;;  %v820_v18 = vld [vmem:[%s1348_s19 + $0x60] sm:$0xff] (!%p804_p5)  ;;  %v261_v22 = vld [vmem:[%s1348_s19 + $0x30] sm:$0xff] (!%p804_p5)  ;;  %vm246_vm5 = vcmp.eq.s32.totalorder (!%p804_p5), %v244_v55, %v245_v54 }
  0x3d   : > { %979 = vmatpush3.bf16.xpose.msk.msra.mxu1 (!%p804_p5), %vm1352_vm2, %v977_v9  ;;  %964 = vmatprep.subr.bf16.mxu0 (!%p804_p5), %v1213_v1  ;;  %v821_v19 = vld [vmem:[%s1348_s19 + $0x68] sm:$0xff] (!%p804_p5)  ;;  %v969_v20 = vpack.c.bf16 (!%p804_p5), %v260_v17, %v259_v16  ;;  %v262_v23 = vld [vmem:[%s1348_s19 + $0x38] sm:$0xff] (!%p804_p5)  ;;  %v822_v24 = vld [vmem:[%s1348_s19 + $0x70] sm:$0xff] (!%p804_p5)  ;;  %v248_v57 = vsel (!%p804_p5), %vm246_vm5, %v247_v56, 0.0 }
  0x3e   : > { %980 = vmatprep.subr.bf16.mxu1 (!%p804_p5), %v1213_v1  ;;  %v985_v21 = vpack.c.bf16 (!%p804_p5), %v821_v19, %v820_v18  ;;  %v823_v25 = vld [vmem:[%s1348_s19 + $0x78] sm:$0xff] (!%p804_p5)  ;;  %v973_v26 = vpack.c.bf16 (!%p804_p5), %v262_v23, %v261_v22  ;;  %v834_v29 = vld [vmem:[%s1408_s11 + $0x40] sm:$0xff] (!%p804_p5)  ;;  %v835_v30 = vld [vmem:[%s1408_s11 + $0x48] sm:$0xff] (!%p804_p5)  ;;  %v250_v58 = vsel (!%p804_p5), %vm249_vm4, %v248_v57, 0.0 }
  0x3f   : > { %v989_v27 = vpack.c.bf16 %v823_v25, %v822_v24  ;;  %v389_v31 = vld [vmem:[%s1408_s11] sm:$0xff]  ;;  %v993_v32 = vpack.c.bf16 %v835_v30, %v834_v29  ;;  %v390_v33 = vld [vmem:[%s1408_s11 + $0x8] sm:$0xff]  ;;  %v836_v35 = vld [vmem:[%s1408_s11 + $0x50] sm:$0xff]  ;;  %251 = vadd.xlane.f32.xlu0 %v250_v58 }
  0x40   : > { %v1005_v34 = vpack.c.bf16 %v390_v33, %v389_v31  ;;  %v837_v36 = vld [vmem:[%s1408_s11 + $0x58] sm:$0xff]  ;;  %v391_v37 = vld [vmem:[%s1408_s11 + $0x10] sm:$0xff]  ;;  %v838_v41 = vld [vmem:[%s1408_s11 + $0x60] sm:$0xff] }
  0x41   : > { %v996_v38 = vpack.c.bf16 %v837_v36, %v836_v35  ;;  %v392_v39 = vld [vmem:[%s1408_s11 + $0x18] sm:$0xff]  ;;  %v839_v42 = vld [vmem:[%s1408_s11 + $0x68] sm:$0xff]  ;;  %v393_v43 = vld [vmem:[%s1408_s11 + $0x20] sm:$0xff] }
  0x42   : > { %v1008_v40 = vpack.c.bf16 %v392_v39, %v391_v37  ;;  %v999_v44 = vpack.c.bf16 %v839_v42, %v838_v41  ;;  %v394_v45 = vld [vmem:[%s1408_s11 + $0x28] sm:$0xff]  ;;  %v840_v47 = vld [vmem:[%s1408_s11 + $0x70] sm:$0xff]  ;;  %v841_v48 = vld [vmem:[%s1408_s11 + $0x78] sm:$0xff] }
  0x43   : > { %v1011_v46 = vpack.c.bf16 %v394_v45, %v393_v43  ;;  %v395_v49 = vld [vmem:[%s1408_s11 + $0x30] sm:$0xff]  ;;  %v1002_v50 = vpack.c.bf16 %v841_v48, %v840_v47  ;;  %v396_v51 = vld [vmem:[%s1408_s11 + $0x38] sm:$0xff]  ;;  %v684_v55 = vld [vmem:[%s1334_s6] sm:$0xff] }
  0x44   : > { %967 = vmatpush3.bf16.xpose.msk.msra.mxu0 %vm1352_vm2, %v965_v14  ;;  %v1014_v52 = vpack.c.bf16 %v396_v51, %v395_v49 }
  0x45   : > { %983 = vmatpush3.bf16.xpose.msk.msra.mxu1 %vm1352_vm2, %v981_v15  ;;  %968 = vmatprep.subr.bf16.mxu0 %v1213_v1 }
  0x46   : > { %984 = vmatprep.subr.bf16.mxu1 %v1213_v1 }
  0x4c   : > { %971 = vmatpush3.bf16.xpose.msk.msra.mxu0 %vm1352_vm2, %v969_v20 }
  0x4d   : > { %987 = vmatpush3.bf16.xpose.msk.msra.mxu1 %vm1352_vm2, %v985_v21  ;;  %972 = vmatprep.subr.bf16.mxu0 %v1213_v1 }
  0x4e   : > { %988 = vmatprep.subr.bf16.mxu1 %v1213_v1 }
  0x54   : > { %975 = vmatpush3.bf16.xpose.msk.msra.mxu0 %vm1352_vm2, %v973_v26 }
  0x55   : > { %991 = vmatpush3.bf16.xpose.msk.msra.mxu1 %vm1352_vm2, %v989_v27  ;;  %1004 = vmatprep.subr.bf16.mxu0 %v1213_v1 }
  0x56   : > { %992 = vmatprep.subr.bf16.mxu1 %v1213_v1 }
  0x5b   : > { %901 = vmatmul.mubr.msk.f32.vlgmr.msra.gmra.mrb[0].mxu0 %vm263_vm1, %v242_v28 }
  0x5c   : > { %920 = vmatmul.mubr.msk.f32.vlgmr.msra.gmra.mrb[0].mxu1 %vm263_vm1, %v242_v28  ;;  %957 = vmatprep.mubr.msk.f32.mxu0 %vm1214_vm3, %v1215_v6 }
  0x5d   : > { %938 = vmatprep.mubr.msk.f32.mxu1 %vm1214_vm3, %v1215_v6  ;;  %994 = vmatpush3.bf16.msra.mxu1 %v993_v32 }
  0x5e   : > { %1006 = vmatpush3.bf16.msra.mxu0 %v1005_v34  ;;  %995 = vmatprep.subr.bf16.mxu1 %v1213_v1 }
  0x5f   : > { %1007 = vmatprep.subr.bf16.mxu0 %v1213_v1 }
  0x61   : > { %997 = vmatpush3.bf16.msra.mxu1 %v996_v38 }
  0x62   : > { %1009 = vmatpush3.bf16.msra.mxu0 %v1008_v40  ;;  %998 = vmatprep.subr.bf16.mxu1 %v1213_v1 }
  0x63   : > { %1010 = vmatprep.subr.bf16.mxu0 %v1213_v1 }
  0x65   : > { %1000 = vmatpush3.bf16.msra.mxu1 %v999_v44 }
  0x66   : > { %1012 = vmatpush3.bf16.msra.mxu0 %v1011_v46  ;;  %1001 = vmatprep.subr.bf16.mxu1 %v1213_v1 }
  0x67   : > { %1013 = vmatprep.subr.bf16.mxu0 %v1213_v1 }
  0x69   : > { %1003 = vmatpush3.bf16.msra.mxu1 %v1002_v50 }
  0x6a   : > { %1015 = vmatpush3.bf16.msra.mxu0 %v1014_v52 }
  0xcc   : > { %v252_v50 = vpop.xlane.xlu0 %251 }
 0x12e   : > { %v357_v59 = vpop.f32.mrb[0].mxu0 }
 0x12f   : > { %v362_v60 = vmul.f32 0.70710677, %v357_v59  ;;  %v497_v61 = vpop.f32.mrb[0].mxu1  ;;  %v902_v62 = vpop.f32.mrb[1].mxu0  ;;  %v361_v42 = vmul.f32 0.5, %v357_v59 }
 0x130   : > { %v502_v63 = vmul.f32 0.70710677, %v497_v61  ;;  %v921_v0 = vpop.f32.mrb[1].mxu1  ;;  %v501_v45 = vmul.f32 0.5, %v497_v61 }
 0x131   : > { %v363_v1 = vand.u32 2147483647, %v362_v60  ;;  %vm383_vm6 = vcmp.ge.f32.partialorder %v362_v60, 0.0 }
 0x132   : > { %v503_v2 = vand.u32 2147483647, %v502_v63  ;;  %vm523_vm7 = vcmp.ge.f32.partialorder %v502_v63, 0.0 }
 0x133   : > { %v364_v3 = vmul.f32 0.3275911, %v363_v1  ;;  %v377_v7 = vsub.f32 0.0, %v363_v1 }
 0x134   : > { %v504_v4 = vmul.f32 0.3275911, %v503_v2  ;;  %v517_v8 = vsub.f32 0.0, %v503_v2 }
 0x135   : > { %v365_v5 = vadd.f32 1.0, %v364_v3  ;;  %v378_v10 = vmul.f32 %v377_v7, %v363_v1 }
 0x136   : > { %v505_v6 = vadd.f32 1.0, %v504_v4  ;;  %v518_v13 = vmul.f32 %v517_v8, %v503_v2 }
 0x137   : > { %1093 = vrcp.f32 %v365_v5  ;;  %v379_v16 = vmul.f32 1.442695, %v378_v10 }
 0x138   : > { %1095 = vrcp.f32 %v505_v6  ;;  %v519_v19 = vmul.f32 1.442695, %v518_v13 }
 0x139   : > { %1097 = vpow2.f32 %v379_v16 }
 0x13a   : > { %1099 = vpow2.f32 %v519_v19 }
 0x141   : > { %v1094_v9 = vpop.eup %1093 }
 0x142   : > { %v1096_v11 = vpop.eup %1095  ;;  %v368_v12 = vmul.f32 1.0614054, %v1094_v9 }
 0x143   : > { %v508_v14 = vmul.f32 1.0614054, %v1096_v11  ;;  %v1098_v32 = vpop.eup %1097 }
 0x144   : > { %v369_v15 = vadd.f32 -1.4531521, %v368_v12  ;;  %v1100_v34 = vpop.eup %1099 }
 0x145   : > { %v509_v17 = vadd.f32 -1.4531521, %v508_v14 }
 0x146   : > { %v370_v18 = vmul.f32 %v1094_v9, %v369_v15 }
 0x147   : > { %v510_v20 = vmul.f32 %v1096_v11, %v509_v17 }
 0x148   : > { %v371_v21 = vadd.f32 1.4214138, %v370_v18 }
 0x149   : > { %v511_v22 = vadd.f32 1.4214138, %v510_v20 }
 0x14a   : > { %v372_v23 = vmul.f32 %v1094_v9, %v371_v21 }
 0x14b   : > { %v512_v24 = vmul.f32 %v1096_v11, %v511_v22 }
 0x14c   : > { %v373_v25 = vadd.f32 -0.28449672, %v372_v23 }
 0x14d   : > { %v513_v26 = vadd.f32 -0.28449672, %v512_v24 }
 0x14e   : > { %v374_v27 = vmul.f32 %v1094_v9, %v373_v25 }
 0x14f   : > { %v514_v28 = vmul.f32 %v1096_v11, %v513_v26 }
 0x150   : > { %v375_v29 = vadd.f32 0.2548296, %v374_v27 }
 0x151   : > { %v515_v30 = vadd.f32 0.2548296, %v514_v28 }
 0x152   : > { %v376_v31 = vmul.f32 %v1094_v9, %v375_v29 }
 0x153   : > { %v516_v33 = vmul.f32 %v1096_v11, %v515_v30 }
 0x154   : > { %v381_v35 = vmul.f32 %v1098_v32, %v376_v31 }
 0x155   : > { %v521_v36 = vmul.f32 %v1100_v34, %v516_v33 }
 0x156   : > { %v382_v37 = vsub.f32 1.0, %v381_v35 }
 0x157   : > { %v522_v38 = vsub.f32 1.0, %v521_v36 }
 0x158   : > { %v384_v39 = vsub.f32 0.0, %v382_v37 }
 0x159   : > { %v524_v40 = vsub.f32 0.0, %v522_v38 }
 0x15a   : > { %v385_v41 = vsel %vm383_vm6, %v382_v37, %v384_v39 }
 0x15b   : > { %v386_v43 = vadd.f32 1.0, %v385_v41  ;;  %v525_v44 = vsel %vm523_vm7, %v522_v38, %v524_v40 }
 0x15c   : > { %v526_v46 = vadd.f32 1.0, %v525_v44 }
 0x15d   : > { %v387_v47 = vmul.f32 %v386_v43, %v361_v42 }
 0x15e   : > { %v527_v48 = vmul.f32 %v526_v46, %v501_v45 }
 0x15f   : > { %958 = vmatmul.mubr.msk.f32.vlgmr.msra.gmra.mrb[2].mxu0 %vm537_vm8, %v387_v47 }
 0x160   : > { %939 = vmatmul.mubr.msk.f32.vlgmr.msra.gmra.mrb[2].mxu1 %vm537_vm8, %v527_v48 }
 0x232   : > { %v680_v49 = vpop.f32.mrb[2].mxu0 }
 0x233   : > { %v607_v51 = vpop.f32.mrb[2].mxu1  ;;  %v959_v52 = vpop.f32.mrb[3].mxu0 }
 0x234   : > { %v681_v53 = vadd.f32 %v680_v49, %v607_v51  ;;  %v940_v54 = vpop.f32.mrb[3].mxu1 }
 0x236   : > { %v685_v56 = vmul.f32 %v681_v53, %v252_v50 }
 0x238   : > { %v686_v57 = vadd.f32 %v685_v56, %v684_v55 }
 0x23a   : > { %687 = vst.msk [vmem:[%s1334_s6] sm:$0xff] %vm263_vm1, %v686_v57 }
 0x23b PF: > { %s845_s25 = sshll.u32 %s1197_s26, 7  ;;  %s702_s16 = sshll.u32 %s1334_s6, 4  ;;  %s703_s16 = int_to_ptr.vmem [resolvable:$true] %s702_s16 }
 0x23c   : > { %s1441_s12 = scalar_lea.hbm %s1496_s5, %s845_s25  ;;  %s689_s17 = scalar_lea.sflag [#allocation5], %s218_s14 }
 0x23d   : > { %s1113_s15 = scalar_lea.vmem %s703_s16, 128  ;;  %s1216_s18 = smov [#allocation4]  }
 0x23e   : > { %p1114_p6 = scmp.ne.s32.totalorder %s703_s16, %s1113_s15  ;;  %s1117_s19 = sshll.u32 %s1216_s18, 4  ;;  %s1118_s19 = int_to_ptr.vmem [resolvable:$false] %s1117_s19 }
 0x23f   : > { %s1119_s21 = scalar_lea.vmem %s1118_s19, 256  ;;  %p1120_p10 = scmp.lt.s32.totalorder %s703_s16, %s1118_s19 }
 0x240   : > { %p1115_p7 = pnand %p1114_p6, %p1299_p8  ;;  %p1121_p11 = scmp.lt.s32.totalorder %s1119_s21, %s1113_s15 }
 0x242   : > { %p1116_p9 = pneg %p1115_p7  ;;  %p1122_p12 = por %p1121_p11, %p1120_p10 }
 0x244   : > { %p1123_p13 = pnand %p1122_p12, %p1116_p9 }
 0x246   : > { %1126 = shalt.err (!%p1123_p13)
}
 0x247   : > { %s1127_s26 = scalar_lea.hbm %s1441_s12, 128  ;;  %s1131_s22 = scalar_lea.hbm %s1496_s5, 256 }
 0x248   : > { %p1128_p1 = scmp.ne.s32.totalorder %s1441_s12, %s1127_s26  ;;  %p1132_p4 = scmp.lt.u32.totalorder %s1441_s12, %s1496_s5 }
 0x249   : > { %p1133_p5 = scmp.lt.u32.totalorder %s1131_s22, %s1127_s26  ;;  %p1135_p7 = scmp.lt.u32.totalorder %s1127_s26, %s1441_s12 }
 0x24a   : > { %p1129_p2 = pnand %p1128_p1, %p1299_p8 }
 0x24b   : > { %p1134_p6 = por %p1133_p5, %p1132_p4 }
 0x24c   : > { %p1130_p3 = pneg %p1129_p2 }
 0x24d   : > { %p1136_p9 = por %p1135_p7, %p1134_p6 }
 0x24f   : > { %p1137_p10 = pnand %p1136_p9, %p1130_p3 }
 0x251   : > { %1140 = shalt.err (!%p1137_p10)
}
 0x252   : > { %1017 = dma.vmem_to_hbm [thread:$0]  (%p1299_p8), %s703_s16, 128, %s1441_s12, %s689_s17  }
 0x253 PF: > { %p1023_p11 = scmp.ge.s32.totalorder %s1209_s29, 2  ;;  %s714_s20 = sand.u32 1, %s1181_s23  }
 0x254   : > { %s715_s30 = scalar_lea.sflag [#allocation5], %s714_s20 }
 0x255   : > { %p1020_p12 = pnand %p1023_p11, %p1309_p0 }
 0x257   : > { %1176 = dma.done.wait (!%p1020_p12), %s715_s30, 128  }
 0x258   : > { %1178 = vsyncadd (!%p1020_p12), %s715_s30, 4294967168  ;;  %s24_s29 = sadd.s32 1, %s1209_s29   ;;  %s1501_s23 = smov %s1185_s24 }
 0x259   : > { %p21_p13 = scmp.ge.s32.totalorder %s24_s29, 10   ;;  %s1502_s24 = smov %s1189_s0 }
 0x25a   : > { %s1503_s0 = smov %s1317_s13  ;;  %s1504_s25 = smov %s1201_s27 }
 0x25b   : > { %s1505_s26 = smov %s1205_s28  ;;  %s1506_s27 = smov %s1509_s7 }
 0x25c   : > { %s1507_s28 = smov %s1513_s8  ;;  %23 = sbr.rel (!%p21_p13) target bundleno = 20 (0x14), region = 86 }
 0x263   :  { %720 = vsyncpa [#allocation5], 1 }
 0x264   :  { %722 = vsyncpa [#allocation5 + $0x1], 1 }

</bundles_post_ra>
